<compile_context>
chip_gen: v6e
topology: v6e:2x2x1
jax: 0.10.0
libtpu: 0.0.40
codegen_flags: <defaults>
</compile_context>

<pallas_src>
import math

import jax
import jax.numpy as jnp
from jax.experimental import pallas as pl
from jax.experimental.pallas import tpu as pltpu

KSIZE = 3
STRIDE = 2


def _round_up(x: int, m: int) -> int:
    return ((x + m - 1) // m) * m


def _cdiv(a: int, b: int) -> int:
    return -(-a // b)


def _vmem_caps():
    """(vmem_limit_bytes for the compiler, byte budget we size tiles against)."""
    try:
        cap = int(pltpu.get_tpu_info().vmem_capacity_bytes)
    except Exception:
        cap = 64 << 20                     # conservative (v7x per-TC) fallback
    limit = min(int(cap * 0.8), 100 << 20)  # headroom for compiler scratch
    budget = int(limit * 0.8)
    return limit, budget


# ----------------------------- Pallas kernels ------------------------------

def _conv_phase_kernel(ph_ref, w_ref, b_ref, o_ref):
    # ph_ref: (1, 4*(THo+1), Wo+1, Cin)  four stride-2 phase slabs, stacked
    # w_ref : (9, Cin, TN)               per-tap weights (VMEM resident)
    # b_ref : (1, TN)                    bias (f32)
    # o_ref : (1, THo*Wo, TN)
    th1 = ph_ref.shape[1] // 4
    tho = th1 - 1
    wo = ph_ref.shape[2] - 1
    cin = ph_ref.shape[3]
    acc = None
    for ky in range(KSIZE):
        for kx in range(KSIZE):
            pidx = 2 * (ky % 2) + (kx % 2)       # phase = (row parity, col parity)
            dy, dx = ky // 2, kx // 2            # halo shift inside the phase
            row0 = pidx * th1 + dy
            # (tho, wo, cin) window; reshape is layout-free when wo % 8 == 0.
            tap = ph_ref[0, row0:row0 + tho, dx:dx + wo, :].reshape(tho * wo, cin)
            d = jnp.dot(tap, w_ref[3 * ky + kx],
                        preferred_element_type=jnp.float32)
            acc = d if acc is None else acc + d
    o_ref[0] = (acc + b_ref[...]).astype(o_ref.dtype)


def _avgpool_kernel(x_ref, o_ref):
    # x_ref: (4, TR, TL) the four 2x2-window phases; o_ref: (TR, TL)
    s = (x_ref[0].astype(jnp.float32) + x_ref[1].astype(jnp.float32)
         + x_ref[2].astype(jnp.float32) + x_ref[3].astype(jnp.float32))
    o_ref[...] = (s * 0.25).astype(o_ref.dtype)


# ------------------------------ JAX wrappers --------------------------------

def downblock_conv(x, w, b, *, compute_dtype=jnp.bfloat16):
    """pad (0,1,0,1) + Conv2d(C, C, 3, stride=2) on NCHW input.

    x: (N, C, H, W); w: (Cout, Cin, 3, 3); b: (Cout,).
    compute_dtype: GEMM operand dtype (bf16 default on all gens; accumulation
    and the bias add are always f32).
    """
    N, _, H, W = x.shape
    Cout, Cin, _, _ = w.shape
    Ho = (H + 1 - KSIZE) // STRIDE + 1
    Wo = (W + 1 - KSIZE) // STRIDE + 1

    cdt = jnp.dtype(compute_dtype) if compute_dtype is not None else jnp.dtype(x.dtype)
    isz = cdt.itemsize
    osz = jnp.dtype(x.dtype).itemsize
    vmem_limit, budget = _vmem_caps()

    # ---- Cout tile: as wide as the budget allows so the weight stays
    #      VMEM-resident across the whole inner (row) grid axis.
    tn_cap = max(128, ((budget // 3) // (2 * 9 * Cin * isz)) // 128 * 128)
    TN = min(_round_up(Cout, 128), tn_cap)
    Cout_pad = _round_up(Cout, TN)
    J = Cout_pad // TN

    # ---- Row tiling over Ho (1-row halo per tile) so blocks fit the budget.
    def _step_bytes(tho):
        phase = 4 * (tho + 1) * (Wo + 1) * Cin * isz
        wgt = 9 * Cin * TN * isz
        outb = tho * Wo * TN * osz
        live = tho * Wo * TN * 4 + tho * Wo * Cin * max(isz, 4)
        return 2 * (phase + wgt + outb) + live          # double-buffered tiles

    n_t = 1
    while _step_bytes(_cdiv(Ho, n_t)) > budget and n_t < Ho:
        n_t += 1
    if J * N * n_t < 2 and Ho >= 2:
        n_t = 2                     # expose >=2 tiles for v7x's two TensorCores
    THo = _cdiv(Ho, n_t)
    Ho_pad = THo * n_t
    R = N * n_t
    M_tile = THo * Wo
    # TODO(synk): also tile Wo (second halo axis) for extreme W * Cin sizes.

    # ---- glue (one fused XLA copy pass): NCHW->NHWC, pad by (0,2)/(0,2),
    #      stride-2 phase split, window into overlapping row tiles.
    x_pad = jnp.pad(jnp.transpose(x, (0, 2, 3, 1)).astype(cdt),
                    ((0, 0), (0, 2), (0, 2), (0, 0)))
    per_phase = []
    for p in (0, 1):
        for q in (0, 1):
            ph = x_pad[:, p::2, q::2, :][:, :Ho + 1, :Wo + 1, :]
            if Ho_pad > Ho:
                ph = jnp.pad(ph, ((0, 0), (0, Ho_pad - Ho), (0, 0), (0, 0)))
            if n_t == 1:
                tiles = ph[:, None]
            else:
                tiles = jnp.stack([ph[:, t * THo:t * THo + THo + 1]
                                   for t in range(n_t)], axis=1)
            per_phase.append(tiles.reshape(R, THo + 1, Wo + 1, Cin))
    phases = jnp.stack(per_phase, axis=1).reshape(R, 4 * (THo + 1), Wo + 1, Cin)

    # weights (Cout, Cin, 3, 3) -> (9, Cin, Cout), tap index = 3*ky + kx.
    w_taps = jnp.transpose(w, (2, 3, 1, 0)).reshape(9, Cin, Cout).astype(cdt)
    b_row = b.astype(jnp.float32).reshape(1, Cout)
    if Cout_pad > Cout:
        w_taps = jnp.pad(w_taps, ((0, 0), (0, 0), (0, Cout_pad - Cout)))
        b_row = jnp.pad(b_row, ((0, 0), (0, Cout_pad - Cout)))

    out = pl.pallas_call(
        _conv_phase_kernel,
        out_shape=jax.ShapeDtypeStruct((R, M_tile, Cout_pad), x.dtype),
        grid=(J, R),                    # j outermost -> weight fetched J times
        in_specs=[
            pl.BlockSpec((1, 4 * (THo + 1), Wo + 1, Cin),
                         lambda j, r: (r, 0, 0, 0)),
            pl.BlockSpec((9, Cin, TN), lambda j, r: (0, 0, j)),
            pl.BlockSpec((1, TN), lambda j, r: (0, j)),
        ],
        out_specs=pl.BlockSpec((1, M_tile, TN), lambda j, r: (r, 0, j)),
        compiler_params=pltpu.CompilerParams(
            dimension_semantics=("parallel", "parallel"),
            vmem_limit_bytes=vmem_limit),
    )(phases, w_taps, b_row)

    out = out[:, :, :Cout].reshape(N, Ho_pad, Wo, Cout)[:, :Ho]
    # Output is 4x smaller than the input; this transpose is the only remaining
    # layout copy (kept so the module still returns NCHW like the PyTorch spec).
    return jnp.transpose(out, (0, 3, 1, 2))


def downblock_pool(x):
    """AvgPool2d(2, 2) on NCHW input (odd trailing rows/cols are floored,
    matching PyTorch)."""
    N, C, H, W = x.shape
    Ho, Wo = H // 2, W // 2
    R, L = N * C, Ho * Wo

    vmem_limit, budget = _vmem_caps()
    isz = jnp.dtype(x.dtype).itemsize

    TL = min(_round_up(L, 128), 2048)
    L_pad = _round_up(L, TL)
    # 4 input phases + 1 output, double-buffered, must fit the budget.
    tr_cap = max(8, (budget // (2 * 5 * TL * isz + 5 * TL * isz)) // 8 * 8)
    TR = min(_round_up(R, 8), 256, tr_cap)
    R_pad = _round_up(R, TR)

    # TODO(synk): fuse the 2x2 phase gather into the kernel (strided in-kernel
    # loads) to avoid this extra ~1x HBM read+write of x.
    xc = x[:, :, :2 * Ho, :2 * Wo].reshape(R, Ho, 2, Wo, 2)
    slabs = jnp.stack(
        [xc[:, :, i, :, j].reshape(R, L) for i in range(2) for j in range(2)],
        axis=0)                                          # (4, R, L)
    slabs = jnp.pad(slabs, ((0, 0), (0, R_pad - R), (0, L_pad - L)))

    out = pl.pallas_call(
        _avgpool_kernel,
        out_shape=jax.ShapeDtypeStruct((R_pad, L_pad), x.dtype),
        grid=(R_pad // TR, L_pad // TL),
        in_specs=[pl.BlockSpec((4, TR, TL), lambda r, l: (0, r, l))],
        out_specs=pl.BlockSpec((TR, TL), lambda r, l: (r, l)),
        compiler_params=pltpu.CompilerParams(
            dimension_semantics=("parallel", "parallel"),
            vmem_limit_bytes=vmem_limit),
    )(slabs)
    return out[:R, :L].reshape(N, C, Ho, Wo)


class DownBlock:
    """JAX/Pallas port of Diffusion.modules.DownBlock."""

    def __init__(self, out_chs: int, with_conv: bool = True, *, key,
                 compute_dtype=jnp.bfloat16):
        self.with_conv = with_conv
        self.compute_dtype = compute_dtype   # bf16 operands, f32 accumulation
        if with_conv:
            # Deterministic init mimicking nn.Conv2d defaults
            # (kaiming-uniform with bound = 1/sqrt(fan_in)).
            kw, kb = jax.random.split(key)
            fan_in = out_chs * KSIZE * KSIZE
            bound = 1.0 / math.sqrt(fan_in)
            self.w = jax.random.uniform(
                kw, (out_chs, out_chs, KSIZE, KSIZE),
                minval=-bound, maxval=bound, dtype=jnp.float32)
            self.b = jax.random.uniform(
                kb, (out_chs,), minval=-bound, maxval=bound, dtype=jnp.float32)

    def __call__(self, x):
        if self.with_conv:
            return downblock_conv(x, self.w, self.b,
                                  compute_dtype=self.compute_dtype)
        return downblock_pool(x)


# --------------------------------- main --------------------------------------

if __name__ == "__main__":
    key = jax.random.PRNGKey(0)
    k_x, k_params = jax.random.split(key)

    N, C, H, W = 2, 4, 16, 16
    x = jax.random.normal(k_x, (N, C, H, W), dtype=jnp.float32)

    # with_conv=True path (default in the PyTorch module), bf16 operands.
    block = DownBlock(out_chs=C, with_conv=True, key=k_params)
    y = jax.block_until_ready(block(x))
    assert y.shape == (N, C, H // 2, W // 2), y.shape

    # Reference with operands rounded to bf16 (kernel uses bf16 operands with
    # f32 accumulation), so the comparison isolates kernel correctness.
    xr = x.astype(jnp.bfloat16).astype(jnp.float32)
    wr = block.w.astype(jnp.bfloat16).astype(jnp.float32)
    ref = jax.lax.conv_general_dilated(
        xr, wr, window_strides=(STRIDE, STRIDE), padding=[(0, 1), (0, 1)],
        dimension_numbers=("NCHW", "OIHW", "NCHW"),
    ) + block.b[None, :, None, None]
    err = float(jnp.max(jnp.abs(y - ref)))
    assert err < 1e-2, err

    # f32 operand path still supported.
    block_f32 = DownBlock(out_chs=C, with_conv=True, key=k_params,
                          compute_dtype=jnp.float32)
    y32 = jax.block_until_ready(block_f32(x))
    ref32 = jax.lax.conv_general_dilated(
        x, block.w, window_strides=(STRIDE, STRIDE), padding=[(0, 1), (0, 1)],
        dimension_numbers=("NCHW", "OIHW", "NCHW"),
    ) + block.b[None, :, None, None]
    assert jnp.allclose(y32, ref32, atol=1e-3, rtol=1e-3), float(
        jnp.max(jnp.abs(y32 - ref32)))

    # with_conv=False path (AvgPool2d(2, 2)).
    block_pool = DownBlock(out_chs=C, with_conv=False, key=k_params)
    y_pool = jax.block_until_ready(block_pool(x))
    ref_pool = x.reshape(N, C, H // 2, 2, W // 2, 2).mean(axis=(3, 5))
    assert jnp.allclose(y_pool, ref_pool, atol=1e-5, rtol=1e-5)

    print("KERNEL_OK")
</pallas_src>

<mosaic_0001>
module attributes {stable_mosaic.version = 11 : i64} {
  func.func @_conv_phase_kernel(%arg0: i32, %arg1: i32, %arg2: memref<1x36x9x4xbf16, #tpu.memory_space<vmem>>, %arg3: memref<9x4x128xbf16, #tpu.memory_space<vmem>>, %arg4: memref<1x128xf32, #tpu.memory_space<vmem>>, %arg5: memref<1x64x128xf32, #tpu.memory_space<vmem>>) attributes {dimension_semantics = [#tpu.dimension_semantics<parallel>, #tpu.dimension_semantics<parallel>], iteration_bounds = array<i64: 1, 2>, scalar_prefetch = 0 : i64, scratch_operands = 0 : i64, tpu.core_type = #tpu.core_type<tc>, window_params = [{transform_indices = @transform_0, window_bounds = array<i64: 1, 36, 9, 4>}, {transform_indices = @transform_1, window_bounds = array<i64: 9, 4, 128>}, {transform_indices = @transform_2, window_bounds = array<i64: 1, 128>}, {transform_indices = @transform_3, window_bounds = array<i64: 1, 64, 128>}]} {
    %c0 = arith.constant 0 : index
    %c0_0 = arith.constant 0 : index
    %c0_1 = arith.constant 0 : index
    %c0_2 = arith.constant 0 : index
    %0 = vector.load %arg2[%c0, %c0_0, %c0_1, %c0_2] : memref<1x36x9x4xbf16, #tpu.memory_space<vmem>>, vector<1x8x8x4xbf16>
    %1 = vector.shape_cast %0 : vector<1x8x8x4xbf16> to vector<8x8x4xbf16>
    %2 = vector.shape_cast %1 : vector<8x8x4xbf16> to vector<64x4xbf16>
    %c0_3 = arith.constant 0 : index
    %c0_4 = arith.constant 0 : index
    %c0_5 = arith.constant 0 : index
    %3 = vector.load %arg3[%c0_3, %c0_4, %c0_5] : memref<9x4x128xbf16, #tpu.memory_space<vmem>>, vector<1x4x128xbf16>
    %4 = vector.shape_cast %3 : vector<1x4x128xbf16> to vector<4x128xbf16>
    %cst = arith.constant dense<0.000000e+00> : vector<64x128xf32>
    %5 = tpu.matmul %2, %4, %cst {dimension_numbers = #tpu.dot_dimension_numbers<[1], [0], [0], [1], [0, 0, 1, 1], [], []>} : vector<64x4xbf16>, vector<4x128xbf16>, vector<64x128xf32> -> vector<64x128xf32>
    %c0_6 = arith.constant 0 : index
    %c9 = arith.constant 9 : index
    %c0_7 = arith.constant 0 : index
    %c0_8 = arith.constant 0 : index
    %6 = vector.load %arg2[%c0_6, %c9, %c0_7, %c0_8] : memref<1x36x9x4xbf16, #tpu.memory_space<vmem>>, vector<1x8x8x4xbf16>
    %7 = vector.shape_cast %6 : vector<1x8x8x4xbf16> to vector<8x8x4xbf16>
    %8 = vector.shape_cast %7 : vector<8x8x4xbf16> to vector<64x4xbf16>
    %c1 = arith.constant 1 : index
    %c0_9 = arith.constant 0 : index
    %c0_10 = arith.constant 0 : index
    %9 = vector.load %arg3[%c1, %c0_9, %c0_10] : memref<9x4x128xbf16, #tpu.memory_space<vmem>>, vector<1x4x128xbf16>
    %10 = vector.shape_cast %9 : vector<1x4x128xbf16> to vector<4x128xbf16>
    %cst_11 = arith.constant dense<0.000000e+00> : vector<64x128xf32>
    %11 = tpu.matmul %8, %10, %cst_11 {dimension_numbers = #tpu.dot_dimension_numbers<[1], [0], [0], [1], [0, 0, 1, 1], [], []>} : vector<64x4xbf16>, vector<4x128xbf16>, vector<64x128xf32> -> vector<64x128xf32>
    %12 = arith.addf %5, %11 : vector<64x128xf32>
    %c0_12 = arith.constant 0 : index
    %c0_13 = arith.constant 0 : index
    %c1_14 = arith.constant 1 : index
    %c0_15 = arith.constant 0 : index
    %13 = vector.load %arg2[%c0_12, %c0_13, %c1_14, %c0_15] : memref<1x36x9x4xbf16, #tpu.memory_space<vmem>>, vector<1x8x8x4xbf16>
    %14 = vector.shape_cast %13 : vector<1x8x8x4xbf16> to vector<8x8x4xbf16>
    %15 = vector.shape_cast %14 : vector<8x8x4xbf16> to vector<64x4xbf16>
    %c2 = arith.constant 2 : index
    %c0_16 = arith.constant 0 : index
    %c0_17 = arith.constant 0 : index
    %16 = vector.load %arg3[%c2, %c0_16, %c0_17] : memref<9x4x128xbf16, #tpu.memory_space<vmem>>, vector<1x4x128xbf16>
    %17 = vector.shape_cast %16 : vector<1x4x128xbf16> to vector<4x128xbf16>
    %cst_18 = arith.constant dense<0.000000e+00> : vector<64x128xf32>
    %18 = tpu.matmul %15, %17, %cst_18 {dimension_numbers = #tpu.dot_dimension_numbers<[1], [0], [0], [1], [0, 0, 1, 1], [], []>} : vector<64x4xbf16>, vector<4x128xbf16>, vector<64x128xf32> -> vector<64x128xf32>
    %19 = arith.addf %12, %18 : vector<64x128xf32>
    %c0_19 = arith.constant 0 : index
    %c18 = arith.constant 18 : index
    %c0_20 = arith.constant 0 : index
    %c0_21 = arith.constant 0 : index
    %20 = vector.load %arg2[%c0_19, %c18, %c0_20, %c0_21] : memref<1x36x9x4xbf16, #tpu.memory_space<vmem>>, vector<1x8x8x4xbf16>
    %21 = vector.shape_cast %20 : vector<1x8x8x4xbf16> to vector<8x8x4xbf16>
    %22 = vector.shape_cast %21 : vector<8x8x4xbf16> to vector<64x4xbf16>
    %c3 = arith.constant 3 : index
    %c0_22 = arith.constant 0 : index
    %c0_23 = arith.constant 0 : index
    %23 = vector.load %arg3[%c3, %c0_22, %c0_23] : memref<9x4x128xbf16, #tpu.memory_space<vmem>>, vector<1x4x128xbf16>
    %24 = vector.shape_cast %23 : vector<1x4x128xbf16> to vector<4x128xbf16>
    %cst_24 = arith.constant dense<0.000000e+00> : vector<64x128xf32>
    %25 = tpu.matmul %22, %24, %cst_24 {dimension_numbers = #tpu.dot_dimension_numbers<[1], [0], [0], [1], [0, 0, 1, 1], [], []>} : vector<64x4xbf16>, vector<4x128xbf16>, vector<64x128xf32> -> vector<64x128xf32>
    %26 = arith.addf %19, %25 : vector<64x128xf32>
    %c0_25 = arith.constant 0 : index
    %c27 = arith.constant 27 : index
    %c0_26 = arith.constant 0 : index
    %c0_27 = arith.constant 0 : index
    %27 = vector.load %arg2[%c0_25, %c27, %c0_26, %c0_27] : memref<1x36x9x4xbf16, #tpu.memory_space<vmem>>, vector<1x8x8x4xbf16>
    %28 = vector.shape_cast %27 : vector<1x8x8x4xbf16> to vector<8x8x4xbf16>
    %29 = vector.shape_cast %28 : vector<8x8x4xbf16> to vector<64x4xbf16>
    %c4 = arith.constant 4 : index
    %c0_28 = arith.constant 0 : index
    %c0_29 = arith.constant 0 : index
    %30 = vector.load %arg3[%c4, %c0_28, %c0_29] : memref<9x4x128xbf16, #tpu.memory_space<vmem>>, vector<1x4x128xbf16>
    %31 = vector.shape_cast %30 : vector<1x4x128xbf16> to vector<4x128xbf16>
    %cst_30 = arith.constant dense<0.000000e+00> : vector<64x128xf32>
    %32 = tpu.matmul %29, %31, %cst_30 {dimension_numbers = #tpu.dot_dimension_numbers<[1], [0], [0], [1], [0, 0, 1, 1], [], []>} : vector<64x4xbf16>, vector<4x128xbf16>, vector<64x128xf32> -> vector<64x128xf32>
    %33 = arith.addf %26, %32 : vector<64x128xf32>
    %c0_31 = arith.constant 0 : index
    %c18_32 = arith.constant 18 : index
    %c1_33 = arith.constant 1 : index
    %c0_34 = arith.constant 0 : index
    %34 = vector.load %arg2[%c0_31, %c18_32, %c1_33, %c0_34] : memref<1x36x9x4xbf16, #tpu.memory_space<vmem>>, vector<1x8x8x4xbf16>
    %35 = vector.shape_cast %34 : vector<1x8x8x4xbf16> to vector<8x8x4xbf16>
    %36 = vector.shape_cast %35 : vector<8x8x4xbf16> to vector<64x4xbf16>
    %c5 = arith.constant 5 : index
    %c0_35 = arith.constant 0 : index
    %c0_36 = arith.constant 0 : index
    %37 = vector.load %arg3[%c5, %c0_35, %c0_36] : memref<9x4x128xbf16, #tpu.memory_space<vmem>>, vector<1x4x128xbf16>
    %38 = vector.shape_cast %37 : vector<1x4x128xbf16> to vector<4x128xbf16>
    %cst_37 = arith.constant dense<0.000000e+00> : vector<64x128xf32>
    %39 = tpu.matmul %36, %38, %cst_37 {dimension_numbers = #tpu.dot_dimension_numbers<[1], [0], [0], [1], [0, 0, 1, 1], [], []>} : vector<64x4xbf16>, vector<4x128xbf16>, vector<64x128xf32> -> vector<64x128xf32>
    %40 = arith.addf %33, %39 : vector<64x128xf32>
    %c0_38 = arith.constant 0 : index
    %c1_39 = arith.constant 1 : index
    %c0_40 = arith.constant 0 : index
    %c0_41 = arith.constant 0 : index
    %41 = vector.load %arg2[%c0_38, %c1_39, %c0_40, %c0_41] : memref<1x36x9x4xbf16, #tpu.memory_space<vmem>>, vector<1x8x8x4xbf16>
    %42 = vector.shape_cast %41 : vector<1x8x8x4xbf16> to vector<8x8x4xbf16>
    %43 = vector.shape_cast %42 : vector<8x8x4xbf16> to vector<64x4xbf16>
    %c6 = arith.constant 6 : index
    %c0_42 = arith.constant 0 : index
    %c0_43 = arith.constant 0 : index
    %44 = vector.load %arg3[%c6, %c0_42, %c0_43] : memref<9x4x128xbf16, #tpu.memory_space<vmem>>, vector<1x4x128xbf16>
    %45 = vector.shape_cast %44 : vector<1x4x128xbf16> to vector<4x128xbf16>
    %cst_44 = arith.constant dense<0.000000e+00> : vector<64x128xf32>
    %46 = tpu.matmul %43, %45, %cst_44 {dimension_numbers = #tpu.dot_dimension_numbers<[1], [0], [0], [1], [0, 0, 1, 1], [], []>} : vector<64x4xbf16>, vector<4x128xbf16>, vector<64x128xf32> -> vector<64x128xf32>
    %47 = arith.addf %40, %46 : vector<64x128xf32>
    %c0_45 = arith.constant 0 : index
    %c10 = arith.constant 10 : index
    %c0_46 = arith.constant 0 : index
    %c0_47 = arith.constant 0 : index
    %48 = vector.load %arg2[%c0_45, %c10, %c0_46, %c0_47] : memref<1x36x9x4xbf16, #tpu.memory_space<vmem>>, vector<1x8x8x4xbf16>
    %49 = vector.shape_cast %48 : vector<1x8x8x4xbf16> to vector<8x8x4xbf16>
    %50 = vector.shape_cast %49 : vector<8x8x4xbf16> to vector<64x4xbf16>
    %c7 = arith.constant 7 : index
    %c0_48 = arith.constant 0 : index
    %c0_49 = arith.constant 0 : index
    %51 = vector.load %arg3[%c7, %c0_48, %c0_49] : memref<9x4x128xbf16, #tpu.memory_space<vmem>>, vector<1x4x128xbf16>
    %52 = vector.shape_cast %51 : vector<1x4x128xbf16> to vector<4x128xbf16>
    %cst_50 = arith.constant dense<0.000000e+00> : vector<64x128xf32>
    %53 = tpu.matmul %50, %52, %cst_50 {dimension_numbers = #tpu.dot_dimension_numbers<[1], [0], [0], [1], [0, 0, 1, 1], [], []>} : vector<64x4xbf16>, vector<4x128xbf16>, vector<64x128xf32> -> vector<64x128xf32>
    %54 = arith.addf %47, %53 : vector<64x128xf32>
    %c0_51 = arith.constant 0 : index
    %c1_52 = arith.constant 1 : index
    %c1_53 = arith.constant 1 : index
    %c0_54 = arith.constant 0 : index
    %55 = vector.load %arg2[%c0_51, %c1_52, %c1_53, %c0_54] : memref<1x36x9x4xbf16, #tpu.memory_space<vmem>>, vector<1x8x8x4xbf16>
    %56 = vector.shape_cast %55 : vector<1x8x8x4xbf16> to vector<8x8x4xbf16>
    %57 = vector.shape_cast %56 : vector<8x8x4xbf16> to vector<64x4xbf16>
    %c8 = arith.constant 8 : index
    %c0_55 = arith.constant 0 : index
    %c0_56 = arith.constant 0 : index
    %58 = vector.load %arg3[%c8, %c0_55, %c0_56] : memref<9x4x128xbf16, #tpu.memory_space<vmem>>, vector<1x4x128xbf16>
    %59 = vector.shape_cast %58 : vector<1x4x128xbf16> to vector<4x128xbf16>
    %cst_57 = arith.constant dense<0.000000e+00> : vector<64x128xf32>
    %60 = tpu.matmul %57, %59, %cst_57 {dimension_numbers = #tpu.dot_dimension_numbers<[1], [0], [0], [1], [0, 0, 1, 1], [], []>} : vector<64x4xbf16>, vector<4x128xbf16>, vector<64x128xf32> -> vector<64x128xf32>
    %61 = arith.addf %54, %60 : vector<64x128xf32>
    %c0_58 = arith.constant 0 : index
    %c0_59 = arith.constant 0 : index
    %62 = vector.load %arg4[%c0_58, %c0_59] : memref<1x128xf32, #tpu.memory_space<vmem>>, vector<1x128xf32>
    %63 = vector.broadcast %62 : vector<1x128xf32> to vector<64x128xf32>
    %64 = arith.addf %61, %63 : vector<64x128xf32>
    %c0_60 = arith.constant 0 : index
    %c0_61 = arith.constant 0 : index
    %c0_62 = arith.constant 0 : index
    %65 = vector.load %arg5[%c0_60, %c0_61, %c0_62] : memref<1x64x128xf32, #tpu.memory_space<vmem>>, vector<1x64x128xf32>
    %66 = vector.shape_cast %65 : vector<1x64x128xf32> to vector<64x128xf32>
    %67 = vector.shape_cast %64 : vector<64x128xf32> to vector<1x64x128xf32>
    tpu.vector_store %arg5[%c0_60, %c0_61, %c0_62], %67 {strides = array<i32>} : memref<1x64x128xf32, #tpu.memory_space<vmem>>, vector<1x64x128xf32>,
    return
  }
  func.func @transform_0(%arg0: i32, %arg1: i32) -> (i32, i32, i32, i32) {
    %c0_i32 = arith.constant 0 : i32
    %c0_i32_0 = arith.constant 0 : i32
    %c0_i32_1 = arith.constant 0 : i32
    %c0_i32_2 = arith.constant 0 : i32
    return %arg1, %c0_i32, %c0_i32_0, %c0_i32_1 : i32, i32, i32, i32
  }
  func.func @transform_1(%arg0: i32, %arg1: i32) -> (i32, i32, i32) {
    %c0_i32 = arith.constant 0 : i32
    %c0_i32_0 = arith.constant 0 : i32
    %c0_i32_1 = arith.constant 0 : i32
    return %c0_i32, %c0_i32_0, %arg0 : i32, i32, i32
  }
  func.func @transform_2(%arg0: i32, %arg1: i32) -> (i32, i32) {
    %c0_i32 = arith.constant 0 : i32
    %c0_i32_0 = arith.constant 0 : i32
    return %c0_i32, %arg0 : i32, i32
  }
  func.func @transform_3(%arg0: i32, %arg1: i32) -> (i32, i32, i32) {
    %c0_i32 = arith.constant 0 : i32
    %c0_i32_0 = arith.constant 0 : i32
    return %arg1, %c0_i32, %arg0 : i32, i32, i32
  }
}

</mosaic_0001>

<bundles_post_ra>
// kernel: tpu_custom_call.1
= control target key start
LH: loop header
LB: loop body
LE: loop exit
PB: predicated region body
PF: predicated region fallthrough
CT: control target
= control target key end

     0   :  { %8 = vsyncpa [#allocation3], 0  ;;  %s2609_s0 = inlined_call_operand.vmem [shape: bf16[2,36,9,4], index: 0, kind: input, shape index: {}]   ;;  %s2610_s1 = inlined_call_operand.vmem [shape: bf16[9,4,128], index: 1, kind: input, shape index: {}]   ;;  %s2611_s2 = inlined_call_operand.vmem [shape: f32[1,128], index: 2, kind: input, shape index: {}]   ;;  %s2612_s3 = inlined_call_operand.hbm [shape: f32[2,64,128], index: 3, kind: output, shape index: {}]  }
   0x1   :  { %10 = vsyncpa [#allocation3 + $0x1], 0  ;;  %s2241_s12 = smov 0   ;;  %s2243_s13 = smov 0  }
   0x2   :  { %s2245_s14 = smov 0   ;;  %s2247_s15 = smov 0  }
   0x3   :  { %s2249_s16 = smov 0   ;;  %s2251_s17 = smov 0  }
   0x4 LB: > { %s1743_s18 = sadd.s32 4294967295, %s2216_s17   ;;  %s1744_s19 = sadd.s32 4294967294, %s2216_s17   ;;  %s2216_s17 = sphi %s2251_s17, %s16_s17   ;;  %s2212_s16 = sphi %s2249_s16, %s2621_s16   ;;  %s2208_s15 = sphi %s2247_s15, %s2620_s15   ;;  %s2204_s14 = sphi %s2245_s14, %s2619_s14   ;;  %s2200_s13 = sphi %s2243_s13, %s2618_s13   ;;  %s2196_s12 = sphi %s2241_s12, %s2617_s12  }
   0x5   : > { %s25_s20 = sadd.s32 1, %s2212_s16  ;;  %s115_s21 = sadd.s32 1, %s2204_s14 }
   0x6   : > { %p26_p0 = scmp.ge.s32.totalorder %s25_s20, 2  ;;  %p125_p1 = scmp.ne.s32.totalorder %s2204_s14, %s2200_s13 }
   0x7   : > { %p126_p2 = scmp.eq.s32.totalorder %s1743_s18, 1  ;;  %p131_p3 = scmp.ne.s32.totalorder %s2200_s13, %s2196_s12 }
   0x8   : > { %s2623_s20 = smov (%p26_p0, %s25_s20), 0  ;;  %p132_p5 = scmp.eq.s32.totalorder %s1744_s19, 1 }
   0x9   : > { %p2281_p4 = por %p126_p2, %p125_p1  ;;  %s110_s23 = ssub.s32 %s2212_s16, %s2623_s20 }
   0xa   : > { %p1749_p6 = scmp.ge.s32.totalorder %s2216_s17, 1  ;;  %p113_p7 = scmp.eq.s32.totalorder %s110_s23, 0 }
   0xb   : > { %p2288_p8 = por %p132_p5, %p131_p3  ;;  %p171_p9 = scmp.lt.s32.totalorder %s2216_s17, 3 }
   0xc   : > { %s2294_s25 = scalar_select %p113_p7, %s2204_s14, %s115_s21  }
   0xd   : > { %p172_p10 = pnand %p1749_p6, %p171_p9 }
   0xe   : > { %p202_p11 = scmp.lt.s32.totalorder (!%p172_p10), %s2208_s15, 1  ;;  %s1910_s10 = sshll.u32 (!%p172_p10), %s2208_s15, 10 }
   0xf   : > { %175 = sbr.rel (%p172_p10) target bundleno = 319 (0x13f), region = 32  ;;  %s2556_s21 = scalar_lea.hbm (!%p172_p10), %s2612_s3, %s1910_s10 }
  0x10   : > { %s2218_s26 = smov (!%p172_p10), [#allocation2]  }
  0x11   : > { %s2144_s27 = sshll.u32 (!%p172_p10), %s2218_s26, 4  ;;  %s2145_s27 = int_to_ptr.vmem [resolvable:$false] %s2144_s27 }
  0x12   : > { %s2146_s28 = scalar_lea.vmem (!%p172_p10), %s2145_s27, 2048 }
  0x14   : > { %v1760_v0 = vld [vmem:[%s2610_s1 + $0x2] sm:$0x3]  ;;  %vm268_vm0 = vcmask 1041408   ;;  %v223_v2 = vld [vmem:[%s2610_s1] sm:$0x3]  ;;  %s203_s5 = scalar_select %p202_p11, %s2208_s15, 1 }
  0x15   : > { %2049 = vmatprep.subr.msk.bf16.mxu1 %vm268_vm0, %v1760_v0  ;;  %2048 = vmatprep.subr.msk.bf16.mxu0 %vm268_vm0, %v1760_v0  ;;  %v270_v1 = vsel %vm268_vm0, %v1760_v0, 0  ;;  %v1777_v3 = vld [vmem:[%s2610_s1 + $0x4] sm:$0x3]  ;;  %vm255_vm1 = vcmask 31744   ;;  %v370_v4 = vsel %vm268_vm0, %v223_v2, 0 }
  0x16   : > { %2047 = vmatpush3.bf16.msra.mxu1 %v270_v1  ;;  %1957 = vmatpush3.bf16.msra.mxu0 %v270_v1  ;;  %s2058_s6 = smul.u32 288, %s203_s5  ;;  %v595_v5 = vsel %vm268_vm0, %v1777_v3, 0  ;;  %v1794_v7 = vld [vmem:[%s2610_s1 + $0x6] sm:$0x3]  ;;  %v1811_v8 = vld [vmem:[%s2610_s1 + $0x8] sm:$0x3] }
  0x17   : > { %2050 = vmatprep.subr.msk.bf16.mxu1 %vm268_vm0, %v223_v2  ;;  %2051 = vmatprep.subr.msk.bf16.mxu0 %vm268_vm0, %v1777_v3  ;;  %vm453_vm2 = vsmask.f32 3328  ;;  %vm454_vm3 = vsmask.f32 7440  ;;  %v714_v13 = vsel %vm268_vm0, %v1794_v7, 0  ;;  %v2336_v14 = vsel %vm268_vm0, %v1811_v8, 0 }
  0x18   : > { %s2315_s9 = scalar_lea.vmem %s2609_s0, %s2058_s6  ;;  %v2353_v38 = vld [vmem:[%s2610_s1 + $0xa] sm:$0x3]  ;;  %vm2357_vm4 = vmor %vm453_vm2, %vm454_vm3  ;;  %s199_s5 = sand.u32 1, %s2200_s13  }
  0x19   : > { %v2116_v6 = vld [vmem:[%s2315_s9 + $0x48] ss:$8 sps:$4 sm:$0xff]   ;;  %v2118_v10 = vld [vmem:[%s2315_s9 + $0x58] ss:$8 sps:$4 sm:$0xff]   ;;  %v438_v16 = vld [vmem:[%s2315_s9 + $0x4] sm:$0x1] }
  0x1a   : > { %v2117_v9 = vld [vmem:[%s2315_s9 + $0x68] ss:$8 sps:$4 sm:$0xff]   ;;  %1958 = vmatprep.mubr.msk.bf16.mxu0 %vm255_vm1, %v2116_v6  ;;  %v2119_v11 = vld [vmem:[%s2315_s9 + $0x78] ss:$8 sps:$4 sm:$0xff]   ;;  %v440_v19 = vld [vmem:[%s2315_s9 + $0xc] sm:$0x1] }
  0x1b   : > { %1962 = vmatprep.mubr.msk.bf16.mxu1 %vm255_vm1, %v2117_v9  ;;  %1959 = vmatmul.mubr.msk.bf16.vlgmr.msra.gmra.mxu0 %vm255_vm1, %v2118_v10  ;;  %v2120_v12 = vld [vmem:[%s2315_s9] ss:$8 sps:$4 sm:$0xff]   ;;  %v2121_v18 = vld [vmem:[%s2315_s9 + $0x10] ss:$8 sps:$4 sm:$0xff]   ;;  %v466_v22 = vshll.u32 %v438_v16, 16  ;;  %v480_v25 = vshll.u32 %v440_v19, 16 }
  0x1c   : > { %1963 = vmatmul.mubr.msk.bf16.vlgmr.msra.gmra.mxu1 %vm255_vm1, %v2119_v11  ;;  %1977 = vmatpush3.bf16.msra.mxu0 %v595_v5  ;;  %v437_v15 = vld [vmem:[%s2315_s9] sm:$0xf]  ;;  %v439_v17 = vld [vmem:[%s2315_s9 + $0x8] sm:$0xf]  ;;  %v441_v26 = vld [vmem:[%s2315_s9 + $0x10] sm:$0xf] }
  0x1d   : > { %1967 = vmatpush3.bf16.msra.mxu1 %v370_v4  ;;  %1968 = vmatprep.mubr.msk.bf16.mxu1 %vm255_vm1, %v2120_v12  ;;  %v457_v20 = vshrl.u32 %v437_v15, 16  ;;  %v460_v21 = vshll.u32 %v437_v15, 16  ;;  %v471_v23 = vshrl.u32 %v439_v17, 16  ;;  %v474_v24 = vshll.u32 %v439_v17, 16  ;;  %v442_v27 = vld [vmem:[%s2315_s9 + $0x14] sm:$0x1] }
  0x1e   : > { %2052 = vmatprep.subr.msk.bf16.mxu1 %vm268_vm0, %v1794_v7  ;;  %2053 = vmatprep.subr.msk.bf16.mxu0 %vm268_vm0, %v1811_v8  ;;  %v468_v30 = vrot.slane %v466_v22, 5  ;;  %v443_v32 = vld [vmem:[%s2315_s9 + $0x18] sm:$0xf]  ;;  %v482_v34 = vrot.slane %v480_v25, 5  ;;  %v444_v35 = vld [vmem:[%s2315_s9 + $0x1c] sm:$0x1] }
  0x1f   : > { %v459_v28 = vrot.slane %v457_v20, 4  ;;  %v462_v29 = vrot.slane %v460_v21, 5  ;;  %v473_v31 = vrot.slane %v471_v23, 4  ;;  %v476_v33 = vrot.slane %v474_v24, 5  ;;  %v2122_v52 = vld [vmem:[%s2315_s9 + $0x20] ss:$8 sps:$4 sm:$0xff]  }
  0x20   : > { %v485_v36 = vshrl.u32 %v441_v26, 16  ;;  %v488_v37 = vshll.u32 %v441_v26, 16  ;;  %v494_v40 = vshll.u32 %v442_v27, 16  ;;  %v499_v41 = vshrl.u32 %v443_v32, 16  ;;  %v2123_v58 = vld [vmem:[%s2315_s9 + $0x30] ss:$8 sps:$4 sm:$0xff]  }
  0x21   : > { %v463_v39 = vor.u32 %v462_v29, %v459_v28  ;;  %v502_v42 = vshll.u32 %v443_v32, 16  ;;  %v477_v44 = vor.u32 %v476_v33, %v473_v31  ;;  %v508_v47 = vshll.u32 %v444_v35, 16  ;;  %v445_v59 = vld [vmem:[%s2315_s9 + $0x20] sm:$0xf]  ;;  %v446_v60 = vld [vmem:[%s2315_s9 + $0x24] sm:$0x1] }
  0x22   : > { %v487_v45 = vrot.slane %v485_v36, 4  ;;  %v490_v46 = vrot.slane %v488_v37, 5  ;;  %v496_v49 = vrot.slane %v494_v40, 5  ;;  %v501_v50 = vrot.slane %v499_v41, 4  ;;  %v447_v63 = vld [vmem:[%s2315_s9 + $0x28] sm:$0xf] }
  0x23   : > { %v464_v48 = vrot.slane %v463_v39, 4  ;;  %v504_v51 = vrot.slane %v502_v42, 5  ;;  %v478_v53 = vrot.slane %v477_v44, 4  ;;  %v510_v55 = vrot.slane %v508_v47, 5  ;;  %v448_v0 = vld [vmem:[%s2315_s9 + $0x2c] sm:$0x1] }
  0x24   : > { %1969 = vmatmul.mubr.msk.bf16.vlgmr.msra.gmra.mxu1 %vm255_vm1, %v2121_v18  ;;  %v491_v54 = vor.u32 %v490_v46, %v487_v45  ;;  %v513_v1 = vshrl.u32 %v445_v59, 16  ;;  %v516_v4 = vshll.u32 %v445_v59, 16  ;;  %v522_v5 = vshll.u32 %v446_v60, 16  ;;  %v449_v6 = vld [vmem:[%s2315_s9 + $0x30] sm:$0xf]  ;;  %s1750_s6 = sshll.u32 %s199_s5, 6 }
  0x25   : > { %1987 = vmatpush3.bf16.msra.mxu1 %v714_v13  ;;  %v469_v56 = vsel %vm2357_vm4, %v464_v48, %v468_v30  ;;  %v505_v57 = vor.u32 %v504_v51, %v501_v50  ;;  %1972 = vmatprep.mubr.msk.bf16.mxu1 %vm255_vm1, %v2122_v52  ;;  %v483_v61 = vsel %vm2357_vm4, %v478_v53, %v482_v34  ;;  %v527_v9 = vshrl.u32 %v447_v63, 16  ;;  %v450_v11 = vld [vmem:[%s2315_s9 + $0x34] sm:$0x1]  ;;  %v451_v17 = vld [vmem:[%s2315_s9 + $0x38] sm:$0xf]  ;;  %s2564_s15 = scalar_lea.sflag [#allocation3], %s199_s5 }
  0x26   : > { %2054 = vmatprep.subr.msk.bf16.mxu1 %vm268_vm0, %v2353_v38  ;;  %v492_v62 = vrot.slane %v491_v54, 4  ;;  %v1778_v2 = vcombine.low %v469_v56, %v483_v61  ;;  %v515_v8 = vrot.slane %v513_v1, 4  ;;  %v530_v10 = vshll.u32 %v447_v63, 16  ;;  %v1853_v18 = vld [vmem:[%s2610_s1 + $0xc] sm:$0x3] }
  0x27   : > { %v506_v3 = vrot.slane %v505_v57, 4  ;;  %v518_v13 = vrot.slane %v516_v4, 5  ;;  %v524_v15 = vrot.slane %v522_v5, 5  ;;  %v536_v16 = vshll.u32 %v448_v0, 16  ;;  %v452_v22 = vld [vmem:[%s2315_s9 + $0x3c] sm:$0x1] }
  0x28   : > { %v497_v7 = vsel %vm2357_vm4, %v492_v62, %v496_v49  ;;  %1978 = vmatprep.mubr.msk.bf16.mxu0 %vm255_vm1, %v1778_v2  ;;  %v529_v20 = vrot.slane %v527_v9, 4  ;;  %v532_v21 = vrot.slane %v530_v10, 5  ;;  %v541_v23 = vshrl.u32 %v449_v6, 16  ;;  %v2124_v35 = vld [vmem:[%s2315_s9 + $0x90] ss:$8 sps:$4 sm:$0xff]  }
  0x29   : > { %v511_v12 = vsel %vm2357_vm4, %v506_v3, %v510_v55  ;;  %v519_v24 = vor.u32 %v518_v13, %v515_v8  ;;  %v538_v25 = vrot.slane %v536_v16, 5  ;;  %v544_v26 = vshll.u32 %v449_v6, 16  ;;  %v2125_v44 = vld [vmem:[%s2315_s9 + $0xa0] ss:$8 sps:$4 sm:$0xff]   ;;  %v1870_v51 = vld [vmem:[%s2610_s1 + $0xe] sm:$0x3] }
  0x2a   : > { %v1779_v19 = vcombine.low %v497_v7, %v511_v12  ;;  %v550_v27 = vshll.u32 %v450_v11, 16  ;;  %v533_v28 = vor.u32 %v532_v21, %v529_v20  ;;  %v543_v29 = vrot.slane %v541_v23, 4  ;;  %v2128_v53 = vld [vmem:[%s2315_s9 + $0xb0] ss:$8 sps:$4 sm:$0xff]   ;;  %v2129_v57 = vld [vmem:[%s2315_s9 + $0xc0] ss:$8 sps:$4 sm:$0xff]  }
  0x2b   : > { %v555_v30 = vshrl.u32 %v451_v17, 16  ;;  %v558_v31 = vshll.u32 %v451_v17, 16  ;;  %v520_v32 = vrot.slane %v519_v24, 4  ;;  %v546_v33 = vrot.slane %v544_v26, 5  ;;  %v1821_v59 = vld [vmem:[%s2315_s9 + $0x94] sm:$0x1] }
  0x2c   : > { %1973 = vmatmul.mubr.msk.bf16.gmra.mxu1 %vm255_vm1, %v2123_v58  ;;  %1979 = vmatmul.mubr.msk.bf16.vlgmr.msra.gmra.mxu0 %vm255_vm1, %v1779_v19  ;;  %v564_v34 = vshll.u32 %v452_v22, 16  ;;  %v534_v36 = vrot.slane %v533_v28, 4  ;;  %v552_v42 = vrot.slane %v550_v27, 5  ;;  %v1063_v49 = vsel %vm268_vm0, %v2353_v38, 0  ;;  %v2126_v38 = vld [vmem:[%s2315_s9 + $0xd8] ss:$8 sps:$4 sm:$0xff]  }
  0x2d   : > { %1997 = vmatpush3.bf16.msra.mxu0 %v2336_v14  ;;  %v557_v37 = vrot.slane %v555_v30, 4  ;;  %v560_v39 = vrot.slane %v558_v31, 5  ;;  %v525_v40 = vsel %vm2357_vm4, %v520_v32, %v524_v15  ;;  %v547_v41 = vor.u32 %v546_v33, %v543_v29  ;;  %1988 = vmatprep.mubr.msk.bf16.mxu1 %vm255_vm1, %v2124_v35  ;;  %v1820_v58 = vld [vmem:[%s2315_s9 + $0x90] sm:$0xf]  ;;  %v1822_v60 = vld [vmem:[%s2315_s9 + $0x98] sm:$0xf] }
  0x2e   : > { %2055 = vmatprep.subr.msk.bf16.mxu0 %vm268_vm0, %v1853_v18  ;;  %v539_v14 = vsel %vm2357_vm4, %v534_v36, %v538_v25  ;;  %v566_v46 = vrot.slane %v564_v34, 5  ;;  %v1182_v56 = vsel %vm268_vm0, %v1853_v18, 0  ;;  %v1823_v61 = vld [vmem:[%s2315_s9 + $0x9c] sm:$0x1]  ;;  %v925_v62 = vshrl.u32 %v1820_v58, 16 }
  0x2f   : > { %v561_v45 = vor.u32 %v560_v39, %v557_v37  ;;  %v1780_v47 = vcombine.low %v525_v40, %v539_v14  ;;  %v548_v48 = vrot.slane %v547_v41, 4  ;;  %v928_v63 = vshll.u32 %v1820_v58, 16  ;;  %v1824_v2 = vld [vmem:[%s2315_s9 + $0xa0] sm:$0xf]  ;;  %v2127_v3 = vld [vmem:[%s2315_s9 + $0xe8] ss:$8 sps:$4 sm:$0xff]  }
  0x30   : > { %v934_v0 = vshll.u32 %v1821_v59, 16  ;;  %v939_v1 = vshrl.u32 %v1822_v60, 16  ;;  %v942_v4 = vshll.u32 %v1822_v60, 16  ;;  %v948_v5 = vshll.u32 %v1823_v61, 16  ;;  %v1825_v6 = vld [vmem:[%s2315_s9 + $0xa4] sm:$0x1] }
  0x31   : > { %v562_v50 = vrot.slane %v561_v45, 4  ;;  %1982 = vmatprep.mubr.msk.bf16.mxu0 %vm255_vm1, %v1780_v47  ;;  %v553_v52 = vsel %vm2357_vm4, %v548_v48, %v552_v42  ;;  %v1826_v7 = vld [vmem:[%s2315_s9 + $0xa8] sm:$0xf]  ;;  %v2130_v8 = vld [vmem:[%s2315_s9 + $0xf8] ss:$8 sps:$4 sm:$0xff]   ;;  %v927_v9 = vrot.slane %v925_v62, 4 }
  0x32   : > { %v930_v10 = vrot.slane %v928_v63, 5  ;;  %v936_v11 = vrot.slane %v934_v0, 5  ;;  %v941_v12 = vrot.slane %v939_v1, 4  ;;  %v1827_v13 = vld [vmem:[%s2315_s9 + $0xac] sm:$0x1]  ;;  %v944_v15 = vrot.slane %v942_v4, 5 }
  0x33   : > { %v567_v54 = vsel %vm2357_vm4, %v562_v50, %v566_v46  ;;  %v950_v16 = vrot.slane %v948_v5, 5  ;;  %v953_v17 = vshrl.u32 %v1824_v2, 16  ;;  %v956_v18 = vshll.u32 %v1824_v2, 16  ;;  %v2431_v27 = vld [vmem:[%s2610_s1 + $0x10] sm:$0x3] }
  0x34   : > { %1989 = vmatmul.mubr.msk.bf16.vlgmr.msra.gmra.mxu1 %vm255_vm1, %v2125_v44  ;;  %v1781_v55 = vcombine.low %v553_v52, %v567_v54  ;;  %v931_v19 = vor.u32 %v930_v10, %v927_v9  ;;  %v962_v20 = vshll.u32 %v1825_v6, 16  ;;  %v967_v21 = vshrl.u32 %v1826_v7, 16  ;;  %v1828_v39 = vld [vmem:[%s2315_s9 + $0xb0] sm:$0xf]  ;;  %v1829_v40 = vld [vmem:[%s2315_s9 + $0xb4] sm:$0x1] }
  0x35   : > { %2007 = vmatpush3.bf16.msra.mxu1 %v1063_v49  ;;  %1992 = vmatprep.mubr.msk.bf16.mxu1 %vm255_vm1, %v2128_v53  ;;  %v970_v22 = vshll.u32 %v1826_v7, 16  ;;  %v945_v23 = vor.u32 %v944_v15, %v941_v12  ;;  %v955_v24 = vrot.slane %v953_v17, 4  ;;  %v958_v25 = vrot.slane %v956_v18, 5  ;;  %v1830_v41 = vld [vmem:[%s2315_s9 + $0xb8] sm:$0xf] }
  0x36   : > { %2056 = vmatprep.subr.msk.bf16.mxu1 %vm268_vm0, %v1870_v51  ;;  %1983 = vmatmul.mubr.msk.bf16.gmra.mxu0 %vm255_vm1, %v1781_v55  ;;  %v976_v26 = vshll.u32 %v1827_v13, 16  ;;  %v932_v28 = vrot.slane %v931_v19, 4  ;;  %v969_v29 = vrot.slane %v967_v21, 4  ;;  %v1301_v31 = vsel %vm268_vm0, %v1870_v51, 0  ;;  %v2131_v42 = vld [vmem:[%s2315_s9 + $0x108] ss:$8 sps:$4 sm:$0xff]  }
  0x37   : > { %1998 = vmatprep.mubr.msk.bf16.mxu0 %vm255_vm1, %v2126_v38  ;;  %v972_v30 = vrot.slane %v970_v22, 5  ;;  %v946_v32 = vrot.slane %v945_v23, 4  ;;  %v959_v33 = vor.u32 %v958_v25, %v955_v24  ;;  %v964_v34 = vrot.slane %v962_v20, 5  ;;  %v1831_v45 = vld [vmem:[%s2315_s9 + $0xbc] sm:$0x1] }
  0x38   : > { %v978_v35 = vrot.slane %v976_v26, 5  ;;  %v937_v36 = vsel %vm2357_vm4, %v932_v28, %v936_v11  ;;  %v981_v46 = vshrl.u32 %v1828_v39, 16  ;;  %v984_v47 = vshll.u32 %v1828_v39, 16  ;;  %v2132_v50 = vld [vmem:[%s2315_s9 + $0x8] ss:$8 sps:$4 sm:$0xff]  }
  0x39   : > { %v973_v37 = vor.u32 %v972_v30, %v969_v29  ;;  %v951_v44 = vsel %vm2357_vm4, %v946_v32, %v950_v16  ;;  %v960_v14 = vrot.slane %v959_v33, 4  ;;  %v990_v51 = vshll.u32 %v1829_v40, 16  ;;  %v1832_v53 = vld [vmem:[%s2315_s9 + $0xc0] sm:$0xf]  ;;  %v1834_v62 = vld [vmem:[%s2315_s9 + $0xc8] sm:$0xf] }
  0x3a   : > { %v1837_v48 = vcombine.low %v937_v36, %v951_v44  ;;  %v995_v52 = vshrl.u32 %v1830_v41, 16  ;;  %v983_v38 = vrot.slane %v981_v46, 4  ;;  %v986_v55 = vrot.slane %v984_v47, 5  ;;  %v1835_v2 = vld [vmem:[%s2315_s9 + $0xcc] sm:$0x1] }
  0x3b   : > { %v974_v49 = vrot.slane %v973_v37, 4  ;;  %v965_v54 = vsel %vm2357_vm4, %v960_v14, %v964_v34  ;;  %v992_v59 = vrot.slane %v990_v51, 5  ;;  %v1004_v61 = vshll.u32 %v1831_v45, 16  ;;  %v2133_v16 = vld [vmem:[%s2315_s9 + $0x18] ss:$8 sps:$4 sm:$0xff]  }
  0x3c   : > { %1993 = vmatmul.mubr.msk.bf16.gmra.mxu1 %vm255_vm1, %v2129_v57  ;;  %v1833_v57 = vld [vmem:[%s2315_s9 + $0xc4] sm:$0x1]  ;;  %v997_v60 = vrot.slane %v995_v52, 4  ;;  %v987_v0 = vor.u32 %v986_v55, %v983_v38  ;;  %v1012_v5 = vshll.u32 %v1832_v53, 16  ;;  %v1023_v7 = vshrl.u32 %v1834_v62, 16 }
  0x3d   : > { %2008 = vmatprep.mubr.msk.bf16.mxu1 %vm255_vm1, %v1837_v48  ;;  %v979_v58 = vsel %vm2357_vm4, %v974_v49, %v978_v35  ;;  %v1006_v4 = vrot.slane %v1004_v61, 5  ;;  %v1018_v6 = vshll.u32 %v1833_v57, 16  ;;  %v1026_v11 = vshll.u32 %v1834_v62, 16  ;;  %v2134_v29 = vld [vmem:[%s2315_s9 + $0x28] ss:$8 sps:$4 sm:$0xff]  }
  0x3e   : > { %1999 = vmatmul.mubr.msk.bf16.vlgmr.msra.gmra.mxu0 %vm255_vm1, %v2127_v3  ;;  %v1838_v63 = vcombine.low %v965_v54, %v979_v58  ;;  %v1009_v3 = vshrl.u32 %v1832_v53, 16  ;;  %v1014_v12 = vrot.slane %v1012_v5, 5  ;;  %v1025_v13 = vrot.slane %v1023_v7, 4  ;;  %v1879_v30 = vld [vmem:[%s2315_s9 + $0x8] sm:$0xf] }
  0x3f   : > { %2017 = vmatpush3.bf16.msra.mxu0 %v1182_v56  ;;  %2002 = vmatprep.mubr.msk.bf16.mxu0 %vm255_vm1, %v2130_v8  ;;  %v998_v56 = vshll.u32 %v1830_v41, 16  ;;  %v988_v8 = vrot.slane %v987_v0, 4  ;;  %v1032_v15 = vshll.u32 %v1835_v2, 16  ;;  %v1028_v19 = vrot.slane %v1026_v11, 5  ;;  %v2136_v32 = vld [vmem:[%s2315_s9 + $0x50] ss:$8 sps:$4 sm:$0xff]  }
  0x40   : > { %2057 = vmatprep.subr.msk.bf16.mxu0 %vm268_vm0, %v2431_v27  ;;  %v1011_v10 = vrot.slane %v1009_v3, 4  ;;  %v1020_v21 = vrot.slane %v1018_v6, 5  ;;  %v1531_v25 = vsel %vm268_vm0, %v2431_v27, 0  ;;  %v1880_v33 = vld [vmem:[%s2315_s9 + $0xc] sm:$0x1]  ;;  %v1393_v35 = vshrl.u32 %v1879_v30, 16 }
  0x41   : > { %v1000_v1 = vrot.slane %v998_v56, 5  ;;  %v993_v17 = vsel %vm2357_vm4, %v988_v8, %v992_v59  ;;  %v1029_v23 = vor.u32 %v1028_v19, %v1025_v13  ;;  %v1034_v24 = vrot.slane %v1032_v15, 5  ;;  %v1881_v34 = vld [vmem:[%s2315_s9 + $0x10] sm:$0xf]  ;;  %v1882_v37 = vld [vmem:[%s2315_s9 + $0x14] sm:$0x1] }
  0x42   : > { %v1015_v20 = vor.u32 %v1014_v12, %v1011_v10  ;;  %v1396_v39 = vshll.u32 %v1879_v30, 16  ;;  %v1402_v27 = vshll.u32 %v1880_v33, 16  ;;  %v1407_v40 = vshrl.u32 %v1881_v34, 16  ;;  %v1883_v45 = vld [vmem:[%s2315_s9 + $0x18] sm:$0xf] }
  0x43   : > { %v1001_v9 = vor.u32 %v1000_v1, %v997_v60  ;;  %v1410_v44 = vshll.u32 %v1881_v34, 16  ;;  %v1416_v14 = vshll.u32 %v1882_v37, 16  ;;  %v2135_v51 = vld [vmem:[%s2315_s9 + $0x38] ss:$8 sps:$4 sm:$0xff]   ;;  %v1886_v38 = vld [vmem:[%s2315_s9 + $0x24] sm:$0x1] }
  0x44   : > { %2009 = vmatmul.mubr.msk.bf16.vlgmr.msra.gmra.mxu1 %vm255_vm1, %v1838_v63  ;;  %v1016_v28 = vrot.slane %v1015_v20, 4  ;;  %v1398_v47 = vrot.slane %v1396_v39, 5  ;;  %v1404_v48 = vrot.slane %v1402_v27, 5  ;;  %v1409_v49 = vrot.slane %v1407_v40, 4  ;;  %v1885_v54 = vld [vmem:[%s2315_s9 + $0x20] sm:$0xf] }
  0x45   : > { %2027 = vmatpush3.bf16.msra.mxu1 %v1301_v31  ;;  %v1002_v18 = vrot.slane %v1001_v9, 4  ;;  %v1030_v31 = vrot.slane %v1029_v23, 4  ;;  %v1412_v52 = vrot.slane %v1410_v44, 5  ;;  %v1418_v53 = vrot.slane %v1416_v14, 5  ;;  %v2137_v63 = vld [vmem:[%s2315_s9 + $0x60] ss:$8 sps:$4 sm:$0xff]  }
  0x46   : > { %2003 = vmatmul.mubr.msk.bf16.gmra.mxu0 %vm255_vm1, %v2131_v42  ;;  %v1021_v36 = vsel %vm2357_vm4, %v1016_v28, %v1020_v21  ;;  %v1395_v42 = vrot.slane %v1393_v35, 4  ;;  %v1421_v56 = vshrl.u32 %v1883_v45, 16  ;;  %v1424_v57 = vshll.u32 %v1883_v45, 16  ;;  %v2138_v6 = vld [vmem:[%s2315_s9 + $0x70] ss:$8 sps:$4 sm:$0xff]  }
  0x47   : > { %2018 = vmatprep.mubr.msk.bf16.mxu0 %vm255_vm1, %v2132_v50  ;;  %v1007_v22 = vsel %vm2357_vm4, %v1002_v18, %v1006_v4  ;;  %v1035_v41 = vsel %vm2357_vm4, %v1030_v31, %v1034_v24  ;;  %v1884_v50 = vld [vmem:[%s2315_s9 + $0x1c] sm:$0x1]  ;;  %v1413_v59 = vor.u32 %v1412_v52, %v1409_v49  ;;  %v1435_v60 = vshrl.u32 %v1885_v54, 16  ;;  %v1887_v11 = vld [vmem:[%s2315_s9 + $0x28] sm:$0xf] }
  0x48   : > { %v1839_v26 = vcombine.low %v993_v17, %v1007_v22  ;;  %v1840_v46 = vcombine.low %v1021_v36, %v1035_v41  ;;  %v1399_v55 = vor.u32 %v1398_v47, %v1395_v42  ;;  %v1430_v58 = vshll.u32 %v1884_v50, 16  ;;  %v1888_v15 = vld [vmem:[%s2315_s9 + $0x2c] sm:$0x1]  ;;  %v1890_v17 = vld [vmem:[%s2315_s9 + $0x34] sm:$0x1] }
  0x49   : > { %v1438_v61 = vshll.u32 %v1885_v54, 16  ;;  %v1444_v62 = vshll.u32 %v1886_v38, 16  ;;  %v1423_v1 = vrot.slane %v1421_v56, 4  ;;  %v1426_v2 = vrot.slane %v1424_v57, 5  ;;  %v1891_v22 = vld [vmem:[%s2315_s9 + $0x38] sm:$0xf] }
  0x4a   : > { %2012 = vmatprep.mubr.msk.bf16.mxu1 %vm255_vm1, %v1839_v26  ;;  %v1400_v0 = vrot.slane %v1399_v55, 4  ;;  %v1414_v3 = vrot.slane %v1413_v59, 4  ;;  %v1437_v4 = vrot.slane %v1435_v60, 4  ;;  %v1432_v9 = vrot.slane %v1430_v58, 5  ;;  %v1892_v28 = vld [vmem:[%s2315_s9 + $0x3c] sm:$0x1] }
  0x4b   : > { %v1440_v5 = vrot.slane %v1438_v61, 5  ;;  %v1427_v8 = vor.u32 %v1426_v2, %v1423_v1  ;;  %v1446_v10 = vrot.slane %v1444_v62, 5  ;;  %v1449_v20 = vshrl.u32 %v1887_v11, 16  ;;  %v1893_v33 = vld [vmem:[%s2315_s9 + $0x40] sm:$0xf] }
  0x4c   : > { %2013 = vmatmul.mubr.msk.bf16.gmra.mxu1 %vm255_vm1, %v1840_v46  ;;  %v1405_v7 = vsel %vm2357_vm4, %v1400_v0, %v1404_v48  ;;  %v1419_v12 = vsel %vm2357_vm4, %v1414_v3, %v1418_v53  ;;  %v1452_v21 = vshll.u32 %v1887_v11, 16  ;;  %v1458_v24 = vshll.u32 %v1888_v15, 16  ;;  %v1894_v39 = vld [vmem:[%s2315_s9 + $0x44] sm:$0x1]  ;;  %v2139_v47 = vld [vmem:[%s2315_s9 + $0x80] ss:$8 sps:$4 sm:$0xff]  }
  0x4d   : > { %2028 = vmatprep.mubr.msk.bf16.mxu1 %vm255_vm1, %v2136_v32  ;;  %v1441_v13 = vor.u32 %v1440_v5, %v1437_v4  ;;  %v1896_v18 = vcombine.low %v1405_v7, %v1419_v12  ;;  %v1428_v19 = vrot.slane %v1427_v8, 4  ;;  %v1451_v30 = vrot.slane %v1449_v20, 4 }
  0x4e   : > { %2019 = vmatmul.mubr.msk.bf16.vlgmr.msra.gmra.mxu0 %vm255_vm1, %v2133_v16  ;;  %v1889_v16 = vld [vmem:[%s2315_s9 + $0x30] sm:$0xf]  ;;  %v1454_v31 = vrot.slane %v1452_v21, 5  ;;  %v1472_v32 = vshll.u32 %v1890_v17, 16  ;;  %v1460_v35 = vrot.slane %v1458_v24, 5  ;;  %v1477_v42 = vshrl.u32 %v1891_v22, 16 }
  0x4f   : > { %2037 = vmatpush3.bf16.msra.mxu0 %v1531_v25  ;;  %2022 = vmatprep.mubr.msk.bf16.mxu0 %vm255_vm1, %v2134_v29  ;;  %v1442_v23 = vrot.slane %v1441_v13, 4  ;;  %v1463_v25 = vshrl.u32 %v1889_v16, 16  ;;  %v1466_v26 = vshll.u32 %v1889_v16, 16  ;;  %v1433_v29 = vsel %vm2357_vm4, %v1428_v19, %v1432_v9  ;;  %s2543_s9 = scalar_lea.vmem [#allocation2], %s1750_s6 }
  0x50   : > { %v1455_v40 = vor.u32 %v1454_v31, %v1451_v30  ;;  %v1474_v41 = vrot.slane %v1472_v32, 5  ;;  %v1480_v14 = vshll.u32 %v1891_v22, 16  ;;  %v1486_v45 = vshll.u32 %v1892_v28, 16  ;;  %s1644_s11 = sshll.u32 %s2543_s9, 4  ;;  %s2558_s11 = int_to_ptr.vmem [resolvable:$true] %s1644_s11 }
  0x51   : > { %v1447_v34 = vsel %vm2357_vm4, %v1442_v23, %v1446_v10  ;;  %v1465_v36 = vrot.slane %v1463_v25, 4  ;;  %v1468_v37 = vrot.slane %v1466_v26, 5  ;;  %v1491_v46 = vshrl.u32 %v1893_v33, 16  ;;  %s2140_s23 = scalar_lea.vmem %s2558_s11, 1024  ;;  %p2147_p1 = scmp.lt.s32.totalorder %s2558_s11, %s2145_s27 }
  0x52   : > { %v1897_v27 = vcombine.low %v1433_v29, %v1447_v34  ;;  %v1456_v48 = vrot.slane %v1455_v40, 4  ;;  %v1479_v49 = vrot.slane %v1477_v42, 4  ;;  %v1494_v50 = vshll.u32 %v1893_v33, 16  ;;  %p2141_p12 = scmp.ne.s32.totalorder %s2558_s11, %s2140_s23  ;;  %p2148_p2 = scmp.lt.s32.totalorder %s2146_s28, %s2140_s23 }
  0x53   : > { %v1469_v44 = vor.u32 %v1468_v37, %v1465_v36  ;;  %v1482_v53 = vrot.slane %v1480_v14, 5  ;;  %v1493_v54 = vrot.slane %v1491_v46, 4  ;;  %v1488_v58 = vrot.slane %v1486_v45, 5 }
  0x54   : > { %2029 = vmatmul.mubr.msk.bf16.vlgmr.msra.gmra.mxu1 %vm255_vm1, %v2137_v63  ;;  %v1461_v38 = vsel %vm2357_vm4, %v1456_v48, %v1460_v35  ;;  %v1496_v55 = vrot.slane %v1494_v50, 5  ;;  %p2142_p13 = pnand %p2141_p12, %p2281_p4  ;;  %p2149_p3 = por %p2148_p2, %p2147_p1 }
  0x55   : > { %2032 = vmatprep.mubr.msk.bf16.mxu1 %vm255_vm1, %v2138_v6  ;;  %v1470_v52 = vrot.slane %v1469_v44, 4  ;;  %v1483_v57 = vor.u32 %v1482_v53, %v1479_v49 }
  0x56   : > { %2023 = vmatmul.mubr.msk.bf16.gmra.mxu0 %vm255_vm1, %v2135_v51  ;;  %v1500_v51 = vshll.u32 %v1894_v39, 16  ;;  %v1497_v60 = vor.u32 %v1496_v55, %v1493_v54  ;;  %p2143_p0 = pneg %p2142_p13 }
  0x57   : > { %2038 = vmatprep.mubr.msk.bf16.mxu0 %vm255_vm1, %v1896_v18  ;;  %v1475_v56 = vsel %vm2357_vm4, %v1470_v52, %v1474_v41  ;;  %v1484_v62 = vrot.slane %v1483_v57, 4 }
  0x58   : > { %v1898_v59 = vcombine.low %v1461_v38, %v1475_v56  ;;  %v1502_v61 = vrot.slane %v1500_v51, 5  ;;  %v1498_v63 = vrot.slane %v1497_v60, 4  ;;  %p2150_p5 = pnand %p2149_p3, %p2143_p0 }
  0x59   : > { %v1489_v0 = vsel %vm2357_vm4, %v1484_v62, %v1488_v58 }
  0x5a   : > { %v1503_v1 = vsel %vm2357_vm4, %v1498_v63, %v1502_v61 }
  0x5b   : > { %v1899_v2 = vcombine.low %v1489_v0, %v1503_v1 }
  0x5c   : > { %2033 = vmatmul.mubr.msk.bf16.gmra.mxu1 %vm255_vm1, %v2139_v47 }
  0x5e   : > { %2039 = vmatmul.mubr.msk.bf16.vlgmr.msra.gmra.mxu0 %vm255_vm1, %v1897_v27 }
  0x5f   : > { %2042 = vmatprep.mubr.msk.bf16.mxu0 %vm255_vm1, %v1898_v59 }
  0x66   : > { %2043 = vmatmul.mubr.msk.bf16.gmra.mxu0 %vm255_vm1, %v1899_v2 }
  0xdb   : > { %v1960_v5 = vpop.f32.mrf.mxu0 }
  0xdc   : > { %v1964_v3 = vpop.f32.mrf.mxu1 }
  0xdd   : > { %v306_v8 = vpop.f32.mrf.mxu0 }
  0xde   : > { %v322_v4 = vpop.f32.mrf.mxu1 }
  0xdf   : > { %v1961_v11 = vpop.f32.mrf.mxu0 }
  0xe0   : > { %v2522_v6 = vpop.f32.mrf.mxu1 }
  0xe1   : > { %v309_v15 = vpop.f32.mrf.mxu0 }
  0xe2   : > { %v2524_v7 = vpop.f32.mrf.mxu1 }
  0xe4   : > { %v1970_v9 = vpop.f32.mrf.mxu1 }
  0xe5   : > { %v415_v14 = vadd.f32 %v1970_v9, %v1960_v5 }
  0xe6   : > { %v406_v10 = vpop.f32.mrf.mxu1 }
  0xe7   : > { %v407_v47 = vadd.f32 %v406_v10, %v306_v8 }
  0xe8   : > { %v1971_v12 = vpop.f32.mrf.mxu1 }
  0xe9   : > { %v418_v50 = vadd.f32 %v1971_v12, %v1961_v11 }
  0xea   : > { %v409_v13 = vpop.f32.mrf.mxu1 }
  0xeb   : > { %v410_v54 = vadd.f32 %v409_v13, %v309_v15 }
  0xec   : > { %v1974_v16 = vpop.f32.mrf.mxu1  ;;  %v1980_v43 = vpop.f32.mrf.mxu0 }
  0xed   : > { %v664_v49 = vadd.f32 %v1980_v43, %v415_v14  ;;  %v431_v61 = vadd.f32 %v1974_v16, %v1964_v3 }
  0xee   : > { %v422_v17 = vpop.f32.mrf.mxu1  ;;  %v631_v18 = vpop.f32.mrf.mxu0 }
  0xef   : > { %v662_v53 = vadd.f32 %v631_v18, %v407_v47  ;;  %v423_v1 = vadd.f32 %v422_v17, %v322_v4 }
  0xf0   : > { %v1975_v19 = vpop.f32.mrf.mxu1  ;;  %v1981_v20 = vpop.f32.mrf.mxu0 }
  0xf1   : > { %v665_v56 = vadd.f32 %v1981_v20, %v418_v50  ;;  %v434_v11 = vadd.f32 %v1975_v19, %v2522_v6 }
  0xf2   : > { %v425_v21 = vpop.f32.mrf.mxu1  ;;  %v634_v22 = vpop.f32.mrf.mxu0 }
  0xf3   : > { %v663_v60 = vadd.f32 %v634_v22, %v410_v54  ;;  %v426_v3 = vadd.f32 %v425_v21, %v2524_v7 }
  0xf4   : > { %v1990_v23 = vpop.f32.mrf.mxu1 }
  0xf5   : > { %v783_v38 = vadd.f32 %v1990_v23, %v664_v49 }
  0xf6   : > { %v750_v24 = vpop.f32.mrf.mxu1  ;;  %v1984_v25 = vpop.f32.mrf.mxu0 }
  0xf7   : > { %v781_v57 = vadd.f32 %v750_v24, %v662_v53  ;;  %v668_v13 = vadd.f32 %v1984_v25, %v431_v61 }
  0xf8   : > { %v1991_v26 = vpop.f32.mrf.mxu1  ;;  %v647_v28 = vpop.f32.mrf.mxu0 }
  0xf9   : > { %v784_v63 = vadd.f32 %v1991_v26, %v665_v56  ;;  %v666_v20 = vadd.f32 %v647_v28, %v423_v1 }
  0xfa   : > { %v753_v29 = vpop.f32.mrf.mxu1  ;;  %v1985_v30 = vpop.f32.mrf.mxu0 }
  0xfb   : > { %v782_v8 = vadd.f32 %v753_v29, %v663_v60  ;;  %v669_v26 = vadd.f32 %v1985_v30, %v434_v11 }
  0xfc   : > { %v1994_v31 = vpop.f32.mrf.mxu1  ;;  %v650_v32 = vpop.f32.mrf.mxu0 }
  0xfd   : > { %v787_v23 = vadd.f32 %v1994_v31, %v668_v13 }
  0xfe   : > { %v766_v33 = vpop.f32.mrf.mxu1  ;;  %v2000_v34 = vpop.f32.mrf.mxu0 }
  0xff   : > { %v902_v62 = vadd.f32 %v2000_v34, %v783_v38  ;;  %v785_v29 = vadd.f32 %v766_v33, %v666_v20  ;;  %v1904_v33 = vld [vmem:[%s2611_s2] ss:$0 sm:$0xff] }
 0x100   : > { %v1995_v35 = vpop.f32.mrf.mxu1  ;;  %v869_v36 = vpop.f32.mrf.mxu0 }
 0x101   : > { %v900_v5 = vadd.f32 %v869_v36, %v781_v57 }
 0x102   : > { %v2001_v37 = vpop.f32.mrf.mxu0  ;;  %v2526_v39 = vpop.f32.mrf.mxu1 }
 0x103   : > { %v903_v15 = vadd.f32 %v2001_v37, %v784_v63  ;;  %v667_v37 = vadd.f32 %v650_v32, %v426_v3 }
 0x104   : > { %v872_v27 = vpop.f32.mrf.mxu0  ;;  %v2010_v41 = vpop.f32.mrf.mxu1 }
 0x105   : > { %v1132_v9 = vadd.f32 %v2010_v41, %v902_v62  ;;  %v901_v22 = vadd.f32 %v872_v27, %v782_v8  ;;  %v788_v41 = vadd.f32 %v1995_v35, %v669_v26  ;;  %v786_v14 = vadd.f32 %v2526_v39, %v667_v37 }
 0x106   : > { %v2004_v40 = vpop.f32.mrf.mxu0  ;;  %v1099_v44 = vpop.f32.mrf.mxu1 }
 0x107   : > { %v1130_v43 = vadd.f32 %v1099_v44, %v900_v5  ;;  %v906_v44 = vadd.f32 %v2004_v40, %v787_v23 }
 0x108   : > { %v885_v42 = vpop.f32.mrf.mxu0  ;;  %v2011_v46 = vpop.f32.mrf.mxu1 }
 0x109   : > { %v1133_v17 = vadd.f32 %v2011_v46, %v903_v15  ;;  %v904_v27 = vadd.f32 %v885_v42, %v785_v29 }
 0x10a   : > { %v2528_v45 = vpop.f32.mrf.mxu0  ;;  %v1102_v51 = vpop.f32.mrf.mxu1 }
 0x10b   : > { %v1131_v19 = vadd.f32 %v1102_v51, %v901_v22  ;;  %v907_v40 = vadd.f32 %v2528_v45, %v788_v41 }
 0x10c   : > { %v2530_v48 = vpop.f32.mrf.mxu0  ;;  %v2014_v58 = vpop.f32.mrf.mxu1 }
 0x10d   : > { %v1136_v47 = vadd.f32 %v2014_v58, %v906_v44  ;;  %v905_v39 = vadd.f32 %v2530_v48, %v786_v14 }
 0x10e   : > { %v2020_v52 = vpop.f32.mrf.mxu0  ;;  %v1115_v0 = vpop.f32.mrf.mxu1 }
 0x10f   : > { %v1251_v4 = vadd.f32 %v2020_v52, %v1132_v9  ;;  %v1134_v51 = vadd.f32 %v1115_v0, %v904_v27 }
 0x110   : > { %v1218_v55 = vpop.f32.mrf.mxu0  ;;  %v2015_v10 = vpop.f32.mrf.mxu1 }
 0x111   : > { %v1249_v6 = vadd.f32 %v1218_v55, %v1130_v43  ;;  %v1137_v56 = vadd.f32 %v2015_v10, %v907_v40 }
 0x112   : > { %v2021_v59 = vpop.f32.mrf.mxu0  ;;  %v1118_v18 = vpop.f32.mrf.mxu1 }
 0x113   : > { %v1252_v7 = vadd.f32 %v2021_v59, %v1133_v17  ;;  %v1135_v59 = vadd.f32 %v1118_v18, %v905_v39 }
 0x114   : > { %v1221_v2 = vpop.f32.mrf.mxu0  ;;  %v2030_v24 = vpop.f32.mrf.mxu1 }
 0x115   : > { %v1370_v25 = vadd.f32 %v2030_v24, %v1251_v4  ;;  %v1250_v46 = vadd.f32 %v1221_v2, %v1131_v19 }
 0x116   : > { %v2024_v12 = vpop.f32.mrf.mxu0  ;;  %v1337_v36 = vpop.f32.mrf.mxu1 }
 0x117   : > { %v1368_v21 = vadd.f32 %v1337_v36, %v1249_v6  ;;  %v1255_v55 = vadd.f32 %v2024_v12, %v1136_v47 }
 0x118   : > { %v1234_v16 = vpop.f32.mrf.mxu0  ;;  %v2031_v31 = vpop.f32.mrf.mxu1 }
 0x119   : > { %v1371_v32 = vadd.f32 %v2031_v31, %v1252_v7  ;;  %v1253_v61 = vadd.f32 %v1234_v16, %v1134_v51 }
 0x11a   : > { %v2025_v34 = vpop.f32.mrf.mxu0  ;;  %v1340_v35 = vpop.f32.mrf.mxu1 }
 0x11b   : > { %v1369_v54 = vadd.f32 %v1340_v35, %v1250_v46  ;;  %v1256_v1 = vadd.f32 %v2025_v34, %v1137_v56 }
 0x11c   : > { %v1237_v28 = vpop.f32.mrf.mxu0  ;;  %v2034_v42 = vpop.f32.mrf.mxu1 }
 0x11d   : > { %v1374_v48 = vadd.f32 %v2034_v42, %v1255_v55  ;;  %v1254_v10 = vadd.f32 %v1237_v28, %v1135_v59 }
 0x11e   : > { %v2040_v30 = vpop.f32.mrf.mxu0  ;;  %v1353_v45 = vpop.f32.mrf.mxu1 }
 0x11f   : > { %v1600_v49 = vadd.f32 %v2040_v30, %v1370_v25  ;;  %v1372_v5 = vadd.f32 %v1353_v45, %v1253_v61 }
 0x120   : > { %v1567_v50 = vpop.f32.mrf.mxu0  ;;  %v2035_v0 = vpop.f32.mrf.mxu1 }
 0x121   : > { %v1615_v52 = vadd.f32 %v1904_v33, %v1600_v49  ;;  %v1598_v53 = vadd.f32 %v1567_v50, %v1368_v21  ;;  %v1375_v12 = vadd.f32 %v2035_v0, %v1256_v1 }
 0x122   : > { %v2041_v38 = vpop.f32.mrf.mxu0  ;;  %v1356_v9 = vpop.f32.mrf.mxu1 }
 0x123   : > { %1623 = vst [vmem:[%s2543_s9 + $0x10] sm:$0xff] %v1615_v52  ;;  %v1613_v57 = vadd.f32 %v1904_v33, %v1598_v53  ;;  %v1601_v58 = vadd.f32 %v2041_v38, %v1371_v32  ;;  %v1373_v18 = vadd.f32 %v1356_v9, %v1254_v10 }
 0x124   : > { %v1570_v60 = vpop.f32.mrf.mxu0 }
 0x125   : > { %1621 = vst [vmem:[%s2543_s9] sm:$0xff] %v1613_v57  ;;  %v1616_v62 = vadd.f32 %v1904_v33, %v1601_v58  ;;  %v1599_v63 = vadd.f32 %v1570_v60, %v1369_v54 }
 0x126   : > { %v2044_v8 = vpop.f32.mrf.mxu0 }
 0x127   : > { %1624 = vst [vmem:[%s2543_s9 + $0x18] sm:$0xff] %v1616_v62  ;;  %v1614_v2 = vadd.f32 %v1904_v33, %v1599_v63  ;;  %v1604_v11 = vadd.f32 %v2044_v8, %v1374_v48 }
 0x128   : > { %v1583_v13 = vpop.f32.mrf.mxu0 }
 0x129   : > { %1622 = vst [vmem:[%s2543_s9 + $0x8] sm:$0xff] %v1614_v2  ;;  %v1619_v15 = vadd.f32 %v1904_v33, %v1604_v11  ;;  %v1602_v43 = vadd.f32 %v1583_v13, %v1372_v5 }
 0x12a   : > { %v2045_v20 = vpop.f32.mrf.mxu0 }
 0x12b   : > { %1627 = vst [vmem:[%s2543_s9 + $0x30] sm:$0xff] %v1619_v15  ;;  %v1617_v3 = vadd.f32 %v1904_v33, %v1602_v43  ;;  %v1605_v16 = vadd.f32 %v2045_v20, %v1375_v12 }
 0x12c   : > { %v1586_v22 = vpop.f32.mrf.mxu0 }
 0x12d   : > { %1625 = vst [vmem:[%s2543_s9 + $0x20] sm:$0xff] %v1617_v3  ;;  %v1620_v23 = vadd.f32 %v1904_v33, %v1605_v16  ;;  %v1603_v4 = vadd.f32 %v1586_v22, %v1373_v18 }
 0x12f   : > { %1628 = vst [vmem:[%s2543_s9 + $0x38] sm:$0xff] %v1620_v23  ;;  %v1618_v17 = vadd.f32 %v1904_v33, %v1603_v4 }
 0x131   : > { %1626 = vst [vmem:[%s2543_s9 + $0x28] sm:$0xff] %v1618_v17 }
 0x132   : > { %2153 = shalt.err (!%p2150_p5)
}
 0x133   : > { %s2154_s29 = scalar_lea.hbm %s2556_s21, 1024  ;;  %s2158_s5 = scalar_lea.hbm %s2612_s3, 2048 }
 0x134   : > { %p2155_p6 = scmp.ne.s32.totalorder %s2556_s21, %s2154_s29  ;;  %p2159_p10 = scmp.lt.s32.totalorder %s2556_s21, %s2612_s3 }
 0x135   : > { %p2160_p11 = scmp.lt.s32.totalorder %s2158_s5, %s2154_s29 }
 0x136   : > { %p2156_p7 = pnand %p2155_p6, %p2281_p4 }
 0x137   : > { %p2161_p12 = por %p2160_p11, %p2159_p10 }
 0x138   : > { %p2157_p9 = pneg %p2156_p7 }
 0x13a   : > { %p2162_p13 = pnand %p2161_p12, %p2157_p9 }
 0x13c   : > { %2165 = shalt.err (!%p2162_p13)
}
 0x13d   : > { %s2219_s8 = smov 128   ;;  %s2220_s9 = smov 8  }
 0x13e   : > { %2059 = dma.vmem_to_hbm [thread:$0]  (%p2281_p4), %s2558_s11, 1024, %s2556_s21, %s2564_s15, %s2219_s8, %s2219_s8, %s2220_s9  }
 0x13f PF: > { %p2065_p0 = scmp.ge.s32.totalorder %s2216_s17, 2  ;;  %s1659_s10 = sand.u32 1, %s2196_s12  }
 0x140   : > { %s1660_s18 = scalar_lea.sflag [#allocation3], %s1659_s10 }
 0x141   : > { %p2062_p1 = pnand %p2065_p0, %p2288_p8 }
 0x143   : > { %p2063_p2 = pneg %p2062_p1 }
 0x145   : > { %2191 = dma.done.wait (%p2063_p2), %s1660_s18, 1024  }
 0x146   : > { %2193 = vsyncadd (%p2063_p2), %s1660_s18, 4294966272  ;;  %s16_s17 = sadd.s32 1, %s2216_s17   ;;  %s2617_s12 = smov %s2200_s13 }
 0x147   : > { %p13_p3 = scmp.ge.s32.totalorder %s16_s17, 4   ;;  %s2618_s13 = smov %s2204_s14 }
 0x148   : > { %s2619_s14 = smov %s2294_s25  ;;  %s2620_s15 = smov %s2212_s16 }
 0x149   : > { %s2621_s16 = smov %s2623_s20  ;;  %15 = sbr.rel (!%p13_p3) target bundleno = 4 (0x4), region = 86 }
 0x14e   :  { %1665 = vsyncpa [#allocation3], 1 }
 0x14f   :  { %1667 = vsyncpa [#allocation3 + $0x1], 1 }

</bundles_post_ra>
